<compile_context>
chip_gen: v6e
topology: v6e:2x2x1
jax: 0.10.0
libtpu: 0.0.40
codegen_flags: <defaults>
</compile_context>

<pallas_src>
import functools
import math

import jax
import jax.numpy as jnp
import numpy as np
from jax.experimental import pallas as pl
from jax.experimental.pallas import tpu as pltpu

# ---- small model config (consistent with the PyTorch module) ----
BATCH = 2
SEQ = 8          # T  (context_size)
EMBED = 32       # C  (embed_size)
NUM_HEADS = 4    # H
HEAD_DIM = EMBED // NUM_HEADS


def _attn_kernel(num_heads,
                 x_ref, wqkv_ref, bqkv_ref, wp_ref, bp_ref, bias_ref, o_ref):
    """Whole-batch causal self-attention.

    x_ref    : (N, C)    f32   (N = B*T rows; batch flattened)
    wqkv_ref : (C, 3C)   bf16  (1/sqrt(D) scale folded into the Q columns)
    bqkv_ref : (1, 3C)   f32   (scale folded into the Q part)
    wp_ref   : (C, C)    bf16
    bp_ref   : (1, C)    f32
    bias_ref : (N, N)    f32   additive mask (0 / -1e30), causal + block-diagonal
    o_ref    : (N, C)    f32
    """
    c = x_ref.shape[1]
    d = c // num_heads

    x = x_ref[...].astype(jnp.bfloat16)                       # cast in-kernel

    # Fused QKV projection: one MXU push, bias added once on the fused result.
    qkv = jnp.dot(x, wqkv_ref[...],
                  preferred_element_type=jnp.float32) + bqkv_ref[...]   # (N, 3C) f32

    bias = bias_ref[...]                                       # (N, N) f32, static

    heads = []
    for h in range(num_heads):                                 # static unroll (H tiny)
        q = qkv[:, h * d:(h + 1) * d].astype(jnp.bfloat16)             # (N, D)
        k = qkv[:, c + h * d:c + (h + 1) * d].astype(jnp.bfloat16)     # (N, D)
        v = qkv[:, 2 * c + h * d:2 * c + (h + 1) * d].astype(jnp.bfloat16)

        # Scores for the whole flattened batch; scale already folded into W_q.
        s = jax.lax.dot_general(
            q, k, dimension_numbers=(((1,), (1,)), ((), ())),
            preferred_element_type=jnp.float32) + bias                 # (N, N) f32

        # Softmax in f32; masked entries underflow to exactly 0.
        m = jnp.max(s, axis=-1, keepdims=True)
        p = jnp.exp(s - m)
        denom = jnp.sum(p, axis=-1, keepdims=True)
        p = p * pl.reciprocal(denom, approx=True)

        y = jnp.dot(p.astype(jnp.bfloat16), v,
                    preferred_element_type=jnp.float32)                # (N, D) f32
        heads.append(y)

    # Lane-concatenate heads (XLU) and do ONE output projection against w_proj.
    y_all = jnp.concatenate(heads, axis=-1).astype(jnp.bfloat16)       # (N, C)
    out = jnp.dot(y_all, wp_ref[...],
                  preferred_element_type=jnp.float32) + bp_ref[...]    # (N, C) f32
    o_ref[...] = out.astype(o_ref.dtype)


def prepare_attention_params(w_attn, b_attn, w_proj, b_proj, *, num_heads):
    """One-time host-side preprocessing (hoisted out of the per-call path).

    w_attn: (C, 3C), b_attn: (3C,), w_proj: (C, C), b_proj: (C,)  — `x @ W + b`
    convention (transpose of torch.nn.Linear.weight).
    """
    C = w_attn.shape[0]
    D = C // num_heads
    scale = 1.0 / math.sqrt(D)
    # Fold the 1/sqrt(D) scale into the Q third of the fused QKV weight/bias.
    col_scale = np.concatenate([np.full((C,), scale, np.float32),
                                np.ones((2 * C,), np.float32)])
    col_scale = jnp.asarray(col_scale)

    w_qkv = (w_attn * col_scale[None, :]).astype(jnp.bfloat16)          # (C, 3C)
    b_qkv = (b_attn * col_scale).reshape(1, 3 * C).astype(jnp.float32)  # (1, 3C)
    w_p = w_proj.astype(jnp.bfloat16)                                   # (C, C)
    b_p = b_proj.reshape(1, C).astype(jnp.float32)                      # (1, C)
    return w_qkv, b_qkv, w_p, b_p


def make_attention_bias(batch, seq):
    """Static additive mask over flattened rows: causal AND same-sequence."""
    n = batch * seq
    row = np.arange(n)[:, None]
    col = np.arange(n)[None, :]
    allowed = ((row // seq) == (col // seq)) & (col <= row)
    return jnp.asarray(np.where(allowed, 0.0, -1e30).astype(np.float32))


@functools.partial(jax.jit, static_argnames=("num_heads",))
def causal_self_attention(x, w_qkv, b_qkv, w_p, b_p, attn_bias, *, num_heads):
    """x: (B, T, C) f32; remaining args from prepare_attention_params / make_attention_bias."""
    B, T, C = x.shape
    x2 = x.reshape(B * T, C)                       # contiguous merge, effectively free

    kernel = functools.partial(_attn_kernel, num_heads)

    # Single invocation (no grid): everything fits in VMEM at these sizes.
    out2 = pl.pallas_call(
        kernel,
        out_shape=jax.ShapeDtypeStruct((B * T, C), jnp.float32),
        in_specs=[pl.BlockSpec(memory_space=pltpu.MemorySpace.VMEM)] * 6,
        out_specs=pl.BlockSpec(memory_space=pltpu.MemorySpace.VMEM),
    )(x2, w_qkv, b_qkv, w_p, b_p, attn_bias)

    return out2.reshape(B, T, C)


def _reference(x, w_attn, b_attn, w_proj, b_proj, num_heads):
    """Pure-JAX f32 reference mirroring the PyTorch forward exactly."""
    B, T, C = x.shape
    H = num_heads
    D = C // H
    qkv = x @ w_attn + b_attn                                       # (B, T, 3C)
    q, k, v = jnp.split(qkv, 3, axis=2)
    q = q.reshape(B, T, H, D).transpose(0, 2, 1, 3)
    k = k.reshape(B, T, H, D).transpose(0, 2, 1, 3)
    v = v.reshape(B, T, H, D).transpose(0, 2, 1, 3)
    att = (q @ k.transpose(0, 1, 3, 2)) / math.sqrt(D)
    mask = jnp.tril(jnp.ones((T, T), dtype=bool))
    att = jnp.where(mask[None, None], att, -jnp.inf)
    att = jax.nn.softmax(att, axis=-1)
    y = att @ v                                                     # (B, H, T, D)
    y = y.transpose(0, 2, 1, 3).reshape(B, T, C)
    return y @ w_proj + b_proj


if __name__ == "__main__":
    key = jax.random.PRNGKey(0)
    kx, k1, k2, k3, k4 = jax.random.split(key, 5)

    # Deterministic synthetic parameters (GPT-style small init, non-zero biases).
    x = jax.random.normal(kx, (BATCH, SEQ, EMBED), dtype=jnp.float32)
    w_attn = 0.02 * jax.random.normal(k1, (EMBED, 3 * EMBED), dtype=jnp.float32)
    b_attn = 0.02 * jax.random.normal(k3, (3 * EMBED,), dtype=jnp.float32)
    w_proj = 0.02 * jax.random.normal(k2, (EMBED, EMBED), dtype=jnp.float32)
    b_proj = 0.02 * jax.random.normal(k4, (EMBED,), dtype=jnp.float32)

    # One-time preprocessing (out of the per-call path).
    params = prepare_attention_params(w_attn, b_attn, w_proj, b_proj,
                                      num_heads=NUM_HEADS)
    attn_bias = make_attention_bias(BATCH, SEQ)

    out = causal_self_attention(x, *params, attn_bias, num_heads=NUM_HEADS)
    out = jax.block_until_ready(out)

    ref = _reference(x, w_attn, b_attn, w_proj, b_proj, NUM_HEADS)
    # Tolerance accounts for bf16 MXU operands (f32 accumulation) and the
    # EUP approximate reciprocal in the softmax.
    np.testing.assert_allclose(np.asarray(out), np.asarray(ref),
                               rtol=2e-2, atol=2e-3)
    print("KERNEL_OK")
</pallas_src>

<mosaic_0001>
module attributes {stable_mosaic.version = 11 : i64} {
  func.func @_attn_kernel(%arg0: memref<16x32xf32, #tpu.memory_space<vmem>>, %arg1: memref<32x96xbf16, #tpu.memory_space<vmem>>, %arg2: memref<1x96xf32, #tpu.memory_space<vmem>>, %arg3: memref<32x32xbf16, #tpu.memory_space<vmem>>, %arg4: memref<1x32xf32, #tpu.memory_space<vmem>>, %arg5: memref<16x16xf32, #tpu.memory_space<vmem>>, %arg6: memref<16x32xf32, #tpu.memory_space<vmem>>) attributes {dimension_semantics = [], scalar_prefetch = 0 : i64, scratch_operands = 0 : i64, tpu.core_type = #tpu.core_type<tc>} {
    %c0 = arith.constant 0 : index
    %c0_0 = arith.constant 0 : index
    %0 = vector.load %arg0[%c0, %c0_0] : memref<16x32xf32, #tpu.memory_space<vmem>>, vector<16x32xf32>
    %1 = arith.truncf %0 : vector<16x32xf32> to vector<16x32xbf16>
    %c0_1 = arith.constant 0 : index
    %c0_2 = arith.constant 0 : index
    %2 = vector.load %arg1[%c0_1, %c0_2] : memref<32x96xbf16, #tpu.memory_space<vmem>>, vector<32x96xbf16>
    %cst = arith.constant dense<0.000000e+00> : vector<16x96xf32>
    %3 = tpu.matmul %1, %2, %cst {dimension_numbers = #tpu.dot_dimension_numbers<[1], [0], [0], [1], [0, 0, 1, 1], [], []>} : vector<16x32xbf16>, vector<32x96xbf16>, vector<16x96xf32> -> vector<16x96xf32>
    %c0_3 = arith.constant 0 : index
    %c0_4 = arith.constant 0 : index
    %4 = vector.load %arg2[%c0_3, %c0_4] : memref<1x96xf32, #tpu.memory_space<vmem>>, vector<1x96xf32>
    %5 = vector.broadcast %4 : vector<1x96xf32> to vector<16x96xf32>
    %6 = arith.addf %3, %5 : vector<16x96xf32>
    %c0_5 = arith.constant 0 : index
    %c0_6 = arith.constant 0 : index
    %7 = vector.load %arg5[%c0_5, %c0_6] : memref<16x16xf32, #tpu.memory_space<vmem>>, vector<16x16xf32>
    %8 = vector.extract_strided_slice %6 {offsets = [0, 0], sizes = [16, 8], strides = [1, 1]} : vector<16x96xf32> to vector<16x8xf32>
    %9 = arith.truncf %8 : vector<16x8xf32> to vector<16x8xbf16>
    %10 = vector.extract_strided_slice %6 {offsets = [0, 32], sizes = [16, 8], strides = [1, 1]} : vector<16x96xf32> to vector<16x8xf32>
    %11 = arith.truncf %10 : vector<16x8xf32> to vector<16x8xbf16>
    %12 = vector.extract_strided_slice %6 {offsets = [0, 64], sizes = [16, 8], strides = [1, 1]} : vector<16x96xf32> to vector<16x8xf32>
    %13 = arith.truncf %12 : vector<16x8xf32> to vector<16x8xbf16>
    %cst_7 = arith.constant dense<0.000000e+00> : vector<16x16xf32>
    %14 = tpu.matmul %9, %11, %cst_7 {dimension_numbers = #tpu.dot_dimension_numbers<[1], [1], [0], [0], [0, 0, 1, 0], [], []>} : vector<16x8xbf16>, vector<16x8xbf16>, vector<16x16xf32> -> vector<16x16xf32>
    %15 = arith.addf %14, %7 : vector<16x16xf32>
    %cst_8 = arith.constant dense<0xFF800000> : vector<16xf32>
    %16 = vector.multi_reduction <maximumf>, %15, %cst_8 [1] : vector<16x16xf32> to vector<16xf32>
    %17 = vector.shape_cast %16 : vector<16xf32> to vector<16x1xf32>
    %18 = vector.broadcast %17 : vector<16x1xf32> to vector<16x16xf32>
    %19 = arith.subf %15, %18 : vector<16x16xf32>
    %20 = math.exp %19 : vector<16x16xf32>
    %cst_9 = arith.constant dense<0.000000e+00> : vector<16xf32>
    %21 = vector.multi_reduction <add>, %20, %cst_9 [1] : vector<16x16xf32> to vector<16xf32>
    %22 = vector.shape_cast %21 : vector<16xf32> to vector<16x1xf32>
    %23 = tpu.reciprocal %22 {approx = true} : vector<16x1xf32> -> vector<16x1xf32>
    %24 = vector.broadcast %23 : vector<16x1xf32> to vector<16x16xf32>
    %25 = arith.mulf %20, %24 : vector<16x16xf32>
    %26 = arith.truncf %25 : vector<16x16xf32> to vector<16x16xbf16>
    %cst_10 = arith.constant dense<0.000000e+00> : vector<16x8xf32>
    %27 = tpu.matmul %26, %13, %cst_10 {dimension_numbers = #tpu.dot_dimension_numbers<[1], [0], [0], [1], [0, 0, 1, 1], [], []>} : vector<16x16xbf16>, vector<16x8xbf16>, vector<16x8xf32> -> vector<16x8xf32>
    %28 = vector.extract_strided_slice %6 {offsets = [0, 8], sizes = [16, 8], strides = [1, 1]} : vector<16x96xf32> to vector<16x8xf32>
    %29 = arith.truncf %28 : vector<16x8xf32> to vector<16x8xbf16>
    %30 = vector.extract_strided_slice %6 {offsets = [0, 40], sizes = [16, 8], strides = [1, 1]} : vector<16x96xf32> to vector<16x8xf32>
    %31 = arith.truncf %30 : vector<16x8xf32> to vector<16x8xbf16>
    %32 = vector.extract_strided_slice %6 {offsets = [0, 72], sizes = [16, 8], strides = [1, 1]} : vector<16x96xf32> to vector<16x8xf32>
    %33 = arith.truncf %32 : vector<16x8xf32> to vector<16x8xbf16>
    %cst_11 = arith.constant dense<0.000000e+00> : vector<16x16xf32>
    %34 = tpu.matmul %29, %31, %cst_11 {dimension_numbers = #tpu.dot_dimension_numbers<[1], [1], [0], [0], [0, 0, 1, 0], [], []>} : vector<16x8xbf16>, vector<16x8xbf16>, vector<16x16xf32> -> vector<16x16xf32>
    %35 = arith.addf %34, %7 : vector<16x16xf32>
    %cst_12 = arith.constant dense<0xFF800000> : vector<16xf32>
    %36 = vector.multi_reduction <maximumf>, %35, %cst_12 [1] : vector<16x16xf32> to vector<16xf32>
    %37 = vector.shape_cast %36 : vector<16xf32> to vector<16x1xf32>
    %38 = vector.broadcast %37 : vector<16x1xf32> to vector<16x16xf32>
    %39 = arith.subf %35, %38 : vector<16x16xf32>
    %40 = math.exp %39 : vector<16x16xf32>
    %cst_13 = arith.constant dense<0.000000e+00> : vector<16xf32>
    %41 = vector.multi_reduction <add>, %40, %cst_13 [1] : vector<16x16xf32> to vector<16xf32>
    %42 = vector.shape_cast %41 : vector<16xf32> to vector<16x1xf32>
    %43 = tpu.reciprocal %42 {approx = true} : vector<16x1xf32> -> vector<16x1xf32>
    %44 = vector.broadcast %43 : vector<16x1xf32> to vector<16x16xf32>
    %45 = arith.mulf %40, %44 : vector<16x16xf32>
    %46 = arith.truncf %45 : vector<16x16xf32> to vector<16x16xbf16>
    %cst_14 = arith.constant dense<0.000000e+00> : vector<16x8xf32>
    %47 = tpu.matmul %46, %33, %cst_14 {dimension_numbers = #tpu.dot_dimension_numbers<[1], [0], [0], [1], [0, 0, 1, 1], [], []>} : vector<16x16xbf16>, vector<16x8xbf16>, vector<16x8xf32> -> vector<16x8xf32>
    %48 = vector.extract_strided_slice %6 {offsets = [0, 16], sizes = [16, 8], strides = [1, 1]} : vector<16x96xf32> to vector<16x8xf32>
    %49 = arith.truncf %48 : vector<16x8xf32> to vector<16x8xbf16>
    %50 = vector.extract_strided_slice %6 {offsets = [0, 48], sizes = [16, 8], strides = [1, 1]} : vector<16x96xf32> to vector<16x8xf32>
    %51 = arith.truncf %50 : vector<16x8xf32> to vector<16x8xbf16>
    %52 = vector.extract_strided_slice %6 {offsets = [0, 80], sizes = [16, 8], strides = [1, 1]} : vector<16x96xf32> to vector<16x8xf32>
    %53 = arith.truncf %52 : vector<16x8xf32> to vector<16x8xbf16>
    %cst_15 = arith.constant dense<0.000000e+00> : vector<16x16xf32>
    %54 = tpu.matmul %49, %51, %cst_15 {dimension_numbers = #tpu.dot_dimension_numbers<[1], [1], [0], [0], [0, 0, 1, 0], [], []>} : vector<16x8xbf16>, vector<16x8xbf16>, vector<16x16xf32> -> vector<16x16xf32>
    %55 = arith.addf %54, %7 : vector<16x16xf32>
    %cst_16 = arith.constant dense<0xFF800000> : vector<16xf32>
    %56 = vector.multi_reduction <maximumf>, %55, %cst_16 [1] : vector<16x16xf32> to vector<16xf32>
    %57 = vector.shape_cast %56 : vector<16xf32> to vector<16x1xf32>
    %58 = vector.broadcast %57 : vector<16x1xf32> to vector<16x16xf32>
    %59 = arith.subf %55, %58 : vector<16x16xf32>
    %60 = math.exp %59 : vector<16x16xf32>
    %cst_17 = arith.constant dense<0.000000e+00> : vector<16xf32>
    %61 = vector.multi_reduction <add>, %60, %cst_17 [1] : vector<16x16xf32> to vector<16xf32>
    %62 = vector.shape_cast %61 : vector<16xf32> to vector<16x1xf32>
    %63 = tpu.reciprocal %62 {approx = true} : vector<16x1xf32> -> vector<16x1xf32>
    %64 = vector.broadcast %63 : vector<16x1xf32> to vector<16x16xf32>
    %65 = arith.mulf %60, %64 : vector<16x16xf32>
    %66 = arith.truncf %65 : vector<16x16xf32> to vector<16x16xbf16>
    %cst_18 = arith.constant dense<0.000000e+00> : vector<16x8xf32>
    %67 = tpu.matmul %66, %53, %cst_18 {dimension_numbers = #tpu.dot_dimension_numbers<[1], [0], [0], [1], [0, 0, 1, 1], [], []>} : vector<16x16xbf16>, vector<16x8xbf16>, vector<16x8xf32> -> vector<16x8xf32>
    %68 = vector.extract_strided_slice %6 {offsets = [0, 24], sizes = [16, 8], strides = [1, 1]} : vector<16x96xf32> to vector<16x8xf32>
    %69 = arith.truncf %68 : vector<16x8xf32> to vector<16x8xbf16>
    %70 = vector.extract_strided_slice %6 {offsets = [0, 56], sizes = [16, 8], strides = [1, 1]} : vector<16x96xf32> to vector<16x8xf32>
    %71 = arith.truncf %70 : vector<16x8xf32> to vector<16x8xbf16>
    %72 = vector.extract_strided_slice %6 {offsets = [0, 88], sizes = [16, 8], strides = [1, 1]} : vector<16x96xf32> to vector<16x8xf32>
    %73 = arith.truncf %72 : vector<16x8xf32> to vector<16x8xbf16>
    %cst_19 = arith.constant dense<0.000000e+00> : vector<16x16xf32>
    %74 = tpu.matmul %69, %71, %cst_19 {dimension_numbers = #tpu.dot_dimension_numbers<[1], [1], [0], [0], [0, 0, 1, 0], [], []>} : vector<16x8xbf16>, vector<16x8xbf16>, vector<16x16xf32> -> vector<16x16xf32>
    %75 = arith.addf %74, %7 : vector<16x16xf32>
    %cst_20 = arith.constant dense<0xFF800000> : vector<16xf32>
    %76 = vector.multi_reduction <maximumf>, %75, %cst_20 [1] : vector<16x16xf32> to vector<16xf32>
    %77 = vector.shape_cast %76 : vector<16xf32> to vector<16x1xf32>
    %78 = vector.broadcast %77 : vector<16x1xf32> to vector<16x16xf32>
    %79 = arith.subf %75, %78 : vector<16x16xf32>
    %80 = math.exp %79 : vector<16x16xf32>
    %cst_21 = arith.constant dense<0.000000e+00> : vector<16xf32>
    %81 = vector.multi_reduction <add>, %80, %cst_21 [1] : vector<16x16xf32> to vector<16xf32>
    %82 = vector.shape_cast %81 : vector<16xf32> to vector<16x1xf32>
    %83 = tpu.reciprocal %82 {approx = true} : vector<16x1xf32> -> vector<16x1xf32>
    %84 = vector.broadcast %83 : vector<16x1xf32> to vector<16x16xf32>
    %85 = arith.mulf %80, %84 : vector<16x16xf32>
    %86 = arith.truncf %85 : vector<16x16xf32> to vector<16x16xbf16>
    %cst_22 = arith.constant dense<0.000000e+00> : vector<16x8xf32>
    %87 = tpu.matmul %86, %73, %cst_22 {dimension_numbers = #tpu.dot_dimension_numbers<[1], [0], [0], [1], [0, 0, 1, 1], [], []>} : vector<16x16xbf16>, vector<16x8xbf16>, vector<16x8xf32> -> vector<16x8xf32>
    %88 = tpu.concatenate %27, %47, %67, %87 in 1 : vector<16x8xf32>, vector<16x8xf32>, vector<16x8xf32>, vector<16x8xf32> -> vector<16x32xf32>
    %89 = arith.truncf %88 : vector<16x32xf32> to vector<16x32xbf16>
    %c0_23 = arith.constant 0 : index
    %c0_24 = arith.constant 0 : index
    %90 = vector.load %arg3[%c0_23, %c0_24] : memref<32x32xbf16, #tpu.memory_space<vmem>>, vector<32x32xbf16>
    %cst_25 = arith.constant dense<0.000000e+00> : vector<16x32xf32>
    %91 = tpu.matmul %89, %90, %cst_25 {dimension_numbers = #tpu.dot_dimension_numbers<[1], [0], [0], [1], [0, 0, 1, 1], [], []>} : vector<16x32xbf16>, vector<32x32xbf16>, vector<16x32xf32> -> vector<16x32xf32>
    %c0_26 = arith.constant 0 : index
    %c0_27 = arith.constant 0 : index
    %92 = vector.load %arg4[%c0_26, %c0_27] : memref<1x32xf32, #tpu.memory_space<vmem>>, vector<1x32xf32>
    %93 = vector.broadcast %92 : vector<1x32xf32> to vector<16x32xf32>
    %94 = arith.addf %91, %93 : vector<16x32xf32>
    %c0_28 = arith.constant 0 : index
    %c0_29 = arith.constant 0 : index
    %95 = vector.load %arg6[%c0_28, %c0_29] : memref<16x32xf32, #tpu.memory_space<vmem>>, vector<16x32xf32>
    tpu.vector_store %arg6[%c0_28, %c0_29], %94 {strides = array<i32>} : memref<16x32xf32, #tpu.memory_space<vmem>>, vector<16x32xf32>,
    return
  }
}

</mosaic_0001>

<bundles_post_ra>
// kernel: causal_self_attention.1
= control target key start
LH: loop header
LB: loop body
LE: loop exit
PB: predicated region body
PF: predicated region fallthrough
CT: control target
= control target key end

     0   :  { %11 = vsyncpa [#allocation3], 0  ;;  %s1229_s0 = inlined_call_operand.hbm [shape: f32[16,32], index: 0, kind: input, shape index: {}]   ;;  %s1230_s1 = inlined_call_operand.hbm [shape: bf16[32,96], index: 1, kind: input, shape index: {}]   ;;  %s1231_s2 = inlined_call_operand.vmem [shape: f32[1,96], index: 2, kind: input, shape index: {}]   ;;  %s1232_s3 = inlined_call_operand.hbm [shape: bf16[32,32], index: 3, kind: input, shape index: {}]   ;;  %s1233_s4 = inlined_call_operand.vmem [shape: f32[1,32], index: 4, kind: input, shape index: {}]   ;;  %s1234_s5 = inlined_call_operand.hbm [shape: f32[16,16], index: 5, kind: input, shape index: {}]   ;;  %s1235_s6 = inlined_call_operand.hbm [shape: f32[16,32], index: 6, kind: output, shape index: {}]  }
   0x1   :  { %12 = vsyncpa [#allocation6], 0 }
   0x2   :  { %13 = vsyncpa [#allocation9], 0 }
   0x3   :  { %14 = vsyncpa [#allocation4], 0  ;;  %s1043_s21 = smov [#allocation5]  }
   0x4   :  { %s32_s22 = sshll.u32 %s1043_s21, 4  ;;  %s33_s22 = int_to_ptr.vmem [resolvable:$true] %s32_s22 }
   0x5   :  { %s943_s23 = scalar_lea.vmem %s33_s22, 256  ;;  %p948_p1 = scmp.lt.s32.totalorder %s33_s22, %s33_s22 }
   0x6   :  { %p944_p0 = scmp.ne.s32.totalorder %s33_s22, %s943_s23  ;;  %p949_p2 = scmp.lt.s32.totalorder %s943_s23, %s943_s23 }
   0x8   :  { %p950_p3 = por %p949_p2, %p948_p1 }
   0xa   :  { %p951_p4 = pnand %p950_p3, %p944_p0 }
   0xc   :  { %954 = shalt.err (!%p951_p4)
}
   0xd   :  { %s1044_s24 = smov 64   ;;  %s1045_s25 = smov 4  }
   0xe   :  { %38 = dma.hbm_to_vmem [thread:$0]  %s1230_s1, 256, %s33_s22, [#allocation6], %s1044_s24, %s1044_s24, %s1045_s25  }
   0xf   :  { %s1046_s28 = smov [#allocation2]  }
  0x10   :  { %s20_s29 = sshll.u32 %s1046_s28, 4  ;;  %s21_s29 = int_to_ptr.vmem [resolvable:$true] %s20_s29 }
  0x11   :  { %s963_s30 = scalar_lea.vmem %s21_s29, 256  ;;  %p968_p6 = scmp.lt.s32.totalorder %s21_s29, %s21_s29 }
  0x12   :  { %p964_p5 = scmp.ne.s32.totalorder %s21_s29, %s963_s30  ;;  %p969_p7 = scmp.lt.s32.totalorder %s963_s30, %s963_s30 }
  0x14   :  { %p970_p8 = por %p969_p7, %p968_p6 }
  0x16   :  { %p971_p9 = pnand %p970_p8, %p964_p5 }
  0x18   :  { %974 = shalt.err (!%p971_p9)
}
  0x19   :  { %s1047_s7 = smov 128   ;;  %s1048_s8 = smov 8  }
  0x1a   :  { %26 = dma.hbm_to_vmem [thread:$0]  %s1229_s0, 256, %s21_s29, [#allocation3], %s1047_s7, %s1047_s7, %s1048_s8  }
  0x1b   :  { %s1049_s1 = smov [#allocation7]   ;;  %s1050_s12 = smov [#allocation8]  }
  0x1c   :  { %s46_s11 = sshll.u32 %s1049_s1, 4  ;;  %s60_s13 = sshll.u32 %s1050_s12, 4  ;;  %s47_s11 = int_to_ptr.vmem [resolvable:$true] %s46_s11  ;;  %s61_s13 = int_to_ptr.vmem [resolvable:$true] %s60_s13 }
  0x1d   :  { %s983_s14 = scalar_lea.vmem %s47_s11, 256  ;;  %p988_p11 = scmp.lt.s32.totalorder %s47_s11, %s47_s11 }
  0x1e   :  { %p984_p10 = scmp.ne.s32.totalorder %s47_s11, %s983_s14  ;;  %p989_p12 = scmp.lt.s32.totalorder %s983_s14, %s983_s14 }
  0x20   :  { %p990_p13 = por %p989_p12, %p988_p11 }
  0x22   :  { %p991_p0 = pnand %p990_p13, %p984_p10 }
  0x24   :  { %994 = shalt.err (!%p991_p0)
}
  0x25   :  { %52 = dma.hbm_to_vmem [thread:$0]  %s1232_s3, 256, %s47_s11, [#allocation6], %s1044_s24, %s1044_s24, %s1045_s25  }
  0x26   :  { %s1003_s0 = scalar_lea.vmem %s61_s13, 256  ;;  %p1008_p2 = scmp.lt.s32.totalorder %s61_s13, %s61_s13 }
  0x27   :  { %p1004_p1 = scmp.ne.s32.totalorder %s61_s13, %s1003_s0  ;;  %p1009_p3 = scmp.lt.s32.totalorder %s1003_s0, %s1003_s0 }
  0x29   :  { %p1010_p4 = por %p1009_p3, %p1008_p2 }
  0x2b   :  { %p1011_p5 = pnand %p1010_p4, %p1004_p1 }
  0x2d   :  { %1014 = shalt.err (!%p1011_p5)
}
  0x2e   :  { %66 = dma.hbm_to_vmem [thread:$0]  %s1234_s5, 256, %s61_s13, [#allocation9], %s1047_s7, %s1047_s7, %s1048_s8  }
  0x2f   :  { %1035 = dma.done.wait [#allocation3], 256  }
  0x30   :  { %1036 = vsyncadd [#allocation3], 4294967040 }
  0x31   :  { %1037 = dma.done.wait [#allocation6], 512  }
  0x32   :  { %1038 = vsyncadd [#allocation6], 4294966784 }
  0x33   :  { %1039 = dma.done.wait [#allocation9], 256  }
  0x34   :  { %1040 = vsyncadd [#allocation9], 4294967040  ;;  %v1051_v0 = vmov 0.0   ;;  %vm1052_vm0 = vmmov 0   ;;  %v899_v1 = vld [vmem:[#allocation5 + $0x8] sm:$0xff]   ;;  %v900_v2 = vld [vmem:[#allocation5] sm:$0xff]  }
  0x35   :  { %797 = vmatprep.subr.bf16.mxu0 %v1051_v0  ;;  %801 = vmatprep.mubr.msk.bf16.mxu0 %vm1052_vm0, %v1051_v0  ;;  %v80_v3 = vld [vmem:[#allocation2] sm:$0xff]  ;;  %v81_v4 = vld [vmem:[#allocation2 + $0x8] sm:$0xff]  ;;  %vm106_vm1 = vcmask 261120   ;;  %s1053_s19 = smov 120   ;;  %s1054_s20 = smov 96   ;;  %vm157_vm2 = vcmask 64512  }
  0x36   :  { %805 = vmatprep.subr.bf16.mxu1 %v1051_v0  ;;  %807 = vmatprep.mubr.msk.bf16.mxu1 %vm1052_vm0, %v1051_v0  ;;  %v82_v5 = vpack.c.bf16 %v81_v4, %v80_v3  ;;  %v759_v7 = vld [vmem:[%s1231_s2] ss:$0 sm:$0xff]  ;;  %s1055_s21 = smov 80   ;;  %s1056_s22 = smov 88   ;;  %v151_v25 = vld [vmem:[#allocation8] sm:$0xff]  ;;  %vm205_vm3 = vcmask 130048  }
  0x37   :  { %798 = vmatpush3.bf16.msra.mxu0 %v899_v1  ;;  %s1057_s2 = smov 72   ;;  %s1058_s23 = smov 112   ;;  %v152_v29 = vld [vmem:[#allocation8 + $0x8] sm:$0xff]  ;;  %vm667_vm4 = vcmask 195584  }
  0x38   :  { %799 = vmatprep.subr.bf16.mxu0 %v1051_v0  ;;  %s1059_s25 = smov 104   ;;  %s1060_s26 = smov 56  }
  0x39   :  { %s1062_s27 = smov 40   ;;  %s1063_s28 = smov 16  }
  0x3a   :  { %s1064_s29 = smov 24   ;;  %s1065_s10 = smov [#allocation10]  }
  0x3b   :  { %800 = vmatpush3.bf16.msra.mxu0 %v900_v2  ;;  %s745_s1 = sshll.u32 %s1065_s10, 4  ;;  %s746_s1 = int_to_ptr.vmem [resolvable:$true] %s745_s1 }
  0x3c   :  { %811 = vmatprep.subr.bf16.mxu0 %v1051_v0  ;;  %s1015_s11 = scalar_lea.vmem %s746_s1, 256  ;;  %p1020_p7 = scmp.lt.s32.totalorder %s746_s1, %s746_s1 }
  0x3d   :  { %p1016_p6 = scmp.ne.s32.totalorder %s746_s1, %s1015_s11  ;;  %p1021_p8 = scmp.lt.s32.totalorder %s1015_s11, %s1015_s11 }
  0x3e   :  { %802 = vmatmul.mubr.msk.bf16.vlgmr.msra.gmra.mxu0 %vm106_vm1, %v82_v5 }
  0x3f   :  { %813 = vmatprep.mubr.msk.bf16.mxu0 %vm1052_vm0, %v1051_v0  ;;  %p1022_p9 = por %p1021_p8, %p1020_p7 }
  0x41   :  { %p1023_p10 = pnand %p1022_p9, %p1016_p6 }
  0xfe   :  { %v144_v6 = vpop.f32.mrf.mxu0 }
  0xff   :  { %v145_v10 = vadd.f32 %v759_v7, %v144_v6 }
 0x100   :  { %v803_v8 = vpop.f32.mrf.mxu0 }
 0x102   :  { %v147_v9 = vpop.f32.mrf.mxu0 }
 0x103   :  { %v148_v11 = vadd.f32 %v759_v7, %v147_v9 }
 0x104   :  { %v804_v12 = vpop.f32.mrf.mxu0 }
 0x105   :  { %v1139_v13 = vpack.c.bf16 %v148_v11, %v145_v10 }
 0x107   :  { %276 = vrot.lane.b32.xlu1 %v1139_v13, %s1053_s19  ;;  %155 = vrot.lane.b32.xlu0 %v1139_v13, %s1054_s20 }
 0x10b   :  { %399 = vrot.lane.b32.xlu1 %v1139_v13, %s1055_s21  ;;  %278 = vrot.lane.b32.xlu0 %v1139_v13, %s1056_s22 }
 0x10f   :  { %520 = vrot.lane.b32.xlu1 %v1139_v13, %s1057_s2  ;;  %397 = vrot.lane.b32.xlu0 %v1139_v13, %s1058_s23 }
 0x113   :  { %518 = vrot.lane.b32.xlu0 %v1139_v13, %s1059_s25 }
 0x179   :  { %v156_v14 = vpop.permute.xlu0 %155  ;;  %v277_v17 = vpop.permute.xlu1 %276 }
 0x17a   :  { %v162_v15 = vsel %vm157_vm2, %v156_v14, 0 }
 0x17b   :  { %806 = vmatpush3.bf16.xpose.msra.mxu1 %v162_v15 }
 0x17c   :  { %817 = vmatprep.subr.bf16.mxu1 %v1051_v0 }
 0x17d   :  { %v279_v16 = vpop.permute.xlu0 %278  ;;  %v400_v19 = vpop.permute.xlu1 %399 }
 0x17e   :  { %v284_v18 = vsel %vm157_vm2, %v279_v16, 0  ;;  %v405_v20 = vsel %vm157_vm2, %v400_v19, 0 }
 0x181   :  { %v521_v21 = vpop.permute.xlu1 %520  ;;  %v398_v22 = vpop.permute.xlu0 %397 }
 0x182   :  { %808 = vmatmul.mubr.msk.bf16.vlgmr.msra.gmra.mxu1 %vm157_vm2, %v1139_v13  ;;  %v526_v23 = vsel %vm157_vm2, %v521_v21, 0 }
 0x183   :  { %818 = vmatpush3.bf16.xpose.msra.mxu1 %v284_v18  ;;  %819 = vmatprep.mubr.msk.bf16.mxu1 %vm1052_vm0, %v1051_v0 }
 0x184   :  { %829 = vmatprep.subr.bf16.mxu1 %v1051_v0 }
 0x185   :  { %v519_v24 = vpop.permute.xlu0 %518 }
 0x18a   :  { %820 = vmatmul.mubr.msk.bf16.vlgmr.msra.gmra.mxu1 %vm157_vm2, %v277_v17 }
 0x18b   :  { %830 = vmatpush3.bf16.xpose.msra.mxu1 %v405_v20  ;;  %831 = vmatprep.mubr.msk.bf16.mxu1 %vm1052_vm0, %v1051_v0 }
 0x18c   :  { %841 = vmatprep.subr.bf16.mxu1 %v1051_v0 }
 0x192   :  { %832 = vmatmul.mubr.msk.bf16.vlgmr.msra.gmra.mxu1 %vm157_vm2, %v398_v22 }
 0x193   :  { %842 = vmatpush3.bf16.xpose.msra.mxu1 %v526_v23  ;;  %843 = vmatprep.mubr.msk.bf16.mxu1 %vm1052_vm0, %v1051_v0 }
 0x194   :  { %853 = vmatprep.subr.bf16.mxu1 %v1051_v0 }
 0x19a   :  { %844 = vmatmul.mubr.msk.bf16.vlgmr.msra.gmra.mxu1 %vm157_vm2, %v519_v24 }
 0x19b   :  { %857 = vmatprep.mubr.msk.bf16.mxu1 %vm1052_vm0, %v1051_v0 }
 0x242   :  { %v198_v26 = vpop.f32.mrf.mxu1 }
 0x243   :  { %v199_v27 = vadd.f32 %v198_v26, %v151_v25 }
 0x244   :  { %v809_v28 = vpop.f32.mrf.mxu1 }
 0x245   :  { %v206_v30 = vsel %vm205_vm3, %v199_v27, -inf }
 0x246   :  { %207 = vmax.xlane.f32.xlu1 %v206_v30  ;;  %v201_v31 = vpop.f32.mrf.mxu1 }
 0x247   :  { %v202_v32 = vadd.f32 %v201_v31, %v152_v29 }
 0x248   :  { %v810_v33 = vpop.f32.mrf.mxu1 }
 0x249   :  { %v209_v34 = vsel %vm205_vm3, %v202_v32, -inf }
 0x24a   :  { %210 = vmax.xlane.f32.xlu0 %v209_v34  ;;  %v320_v35 = vpop.f32.mrf.mxu1 }
 0x24b   :  { %v321_v36 = vadd.f32 %v320_v35, %v151_v25 }
 0x24c   :  { %v821_v37 = vpop.f32.mrf.mxu1 }
 0x24d   :  { %v327_v38 = vsel %vm205_vm3, %v321_v36, -inf }
 0x24e   :  { %328 = vmax.xlane.f32.xlu0 %v327_v38  ;;  %v323_v39 = vpop.f32.mrf.mxu1 }
 0x24f   :  { %v324_v40 = vadd.f32 %v323_v39, %v152_v29 }
 0x250   :  { %v822_v41 = vpop.f32.mrf.mxu1 }
 0x251   :  { %v330_v42 = vsel %vm205_vm3, %v324_v40, -inf }
 0x252   :  { %331 = vmax.xlane.f32.xlu1 %v330_v42  ;;  %v441_v43 = vpop.f32.mrf.mxu1 }
 0x253   :  { %v442_v44 = vadd.f32 %v441_v43, %v151_v25 }
 0x254   :  { %v833_v45 = vpop.f32.mrf.mxu1 }
 0x255   :  { %v448_v46 = vsel %vm205_vm3, %v442_v44, -inf }
 0x256   :  { %449 = vmax.xlane.f32.xlu0 %v448_v46  ;;  %v444_v47 = vpop.f32.mrf.mxu1 }
 0x257   :  { %v445_v48 = vadd.f32 %v444_v47, %v152_v29 }
 0x258   :  { %v834_v49 = vpop.f32.mrf.mxu1 }
 0x259   :  { %v451_v50 = vsel %vm205_vm3, %v445_v48, -inf }
 0x25a   :  { %452 = vmax.xlane.f32.xlu1 %v451_v50  ;;  %v562_v51 = vpop.f32.mrf.mxu1 }
 0x25b   :  { %v563_v52 = vadd.f32 %v562_v51, %v151_v25 }
 0x25c   :  { %v845_v53 = vpop.f32.mrf.mxu1 }
 0x25d   :  { %v569_v54 = vsel %vm205_vm3, %v563_v52, -inf }
 0x25e   :  { %570 = vmax.xlane.f32.xlu0 %v569_v54  ;;  %v565_v55 = vpop.f32.mrf.mxu1 }
 0x25f   :  { %v566_v56 = vadd.f32 %v565_v55, %v152_v29 }
 0x260   :  { %v846_v57 = vpop.f32.mrf.mxu1 }
 0x261   :  { %v572_v58 = vsel %vm205_vm3, %v566_v56, -inf }
 0x262   :  { %573 = vmax.xlane.f32.xlu1 %v572_v58 }
 0x2cf   :  { %v208_v59 = vpop.xlane.xlu1 %207 }
 0x2d0   :  { %v212_v60 = vsub.f32 %v199_v27, %v208_v59 }
 0x2d2   :  { %v214_v61 = vmul.f32 1.442695, %v212_v60 }
 0x2d3   :  { %v211_v62 = vpop.xlane.xlu0 %210 }
 0x2d4   :  { %903 = vpow2.f32 %v214_v61  ;;  %v213_v63 = vsub.f32 %v202_v32, %v211_v62 }
 0x2d6   :  { %v216_v1 = vmul.f32 1.442695, %v213_v63 }
 0x2d7   :  { %v329_v2 = vpop.xlane.xlu0 %328 }
 0x2d8   :  { %905 = vpow2.f32 %v216_v1  ;;  %v333_v3 = vsub.f32 %v321_v36, %v329_v2 }
 0x2da   :  { %v335_v4 = vmul.f32 1.442695, %v333_v3 }
 0x2db   :  { %v332_v11 = vpop.xlane.xlu1 %331 }
 0x2dc   :  { %907 = vpow2.f32 %v335_v4  ;;  %v334_v12 = vsub.f32 %v324_v40, %v332_v11 }
 0x2de   :  { %v337_v17 = vmul.f32 1.442695, %v334_v12  ;;  %v901_v12 = vld [vmem:[#allocation7 + $0x8] sm:$0xff]  }
 0x2df   :  { %v450_v14 = vpop.xlane.xlu0 %449  ;;  %854 = vmatpush3.bf16.msra.mxu1 %v901_v12 }
 0x2e0   :  { %v454_v16 = vsub.f32 %v442_v44, %v450_v14  ;;  %909 = vpow2.f32 %v337_v17  ;;  %855 = vmatprep.subr.bf16.mxu1 %v1051_v0 }
 0x2e1   :  { %v904_v5 = vpop.eup %903 }
 0x2e2   :  { %v218_v6 = vsel %vm205_vm3, %v904_v5, 0.0  ;;  %v456_v21 = vmul.f32 1.442695, %v454_v16 }
 0x2e3   :  { %219 = vadd.xlane.f32.xlu0 %v218_v6  ;;  %v453_v15 = vpop.xlane.xlu1 %452 }
 0x2e4   :  { %v455_v18 = vsub.f32 %v445_v48, %v453_v15  ;;  %911 = vpow2.f32 %v456_v21 }
 0x2e5   :  { %v906_v7 = vpop.eup %905 }
 0x2e6   :  { %v221_v8 = vsel %vm205_vm3, %v906_v7, 0.0  ;;  %v458_v23 = vmul.f32 1.442695, %v455_v18  ;;  %v902_v18 = vld [vmem:[#allocation7] sm:$0xff]  }
 0x2e7   :  { %222 = vadd.xlane.f32.xlu1 %v221_v8  ;;  %v571_v19 = vpop.xlane.xlu0 %570  ;;  %856 = vmatpush3.bf16.msra.mxu1 %v902_v18 }
 0x2e8   :  { %v575_v22 = vsub.f32 %v563_v52, %v571_v19  ;;  %913 = vpow2.f32 %v458_v23 }
 0x2e9   :  { %v1179_v9 = vpop.eup %907 }
 0x2ea   :  { %v339_v10 = vsel %vm205_vm3, %v1179_v9, 0.0  ;;  %v577_v25 = vmul.f32 1.442695, %v575_v22 }
 0x2eb   :  { %340 = vadd.xlane.f32.xlu0 %v339_v10  ;;  %v574_v20 = vpop.xlane.xlu1 %573 }
 0x2ec   :  { %v576_v24 = vsub.f32 %v566_v56, %v574_v20  ;;  %915 = vpow2.f32 %v577_v25 }
 0x2ed   :  { %v910_v27 = vpop.eup %909 }
 0x2ee   :  { %v579_v26 = vmul.f32 1.442695, %v576_v24  ;;  %v342_v29 = vsel %vm205_vm3, %v910_v27, 0.0 }
 0x2f0   :  { %917 = vpow2.f32 %v579_v26 }
 0x2f1   :  { %v912_v28 = vpop.eup %911 }
 0x2f2   :  { %v460_v33 = vsel %vm205_vm3, %v912_v28, 0.0 }
 0x2f5   :  { %v914_v30 = vpop.eup %913 }
 0x2f6   :  { %v463_v32 = vsel %vm205_vm3, %v914_v30, 0.0 }
 0x2f8   :  { %350 = vrot.lane.b32.xlu1 %v1139_v13, %s1060_s26 }
 0x2f9   :  { %v1187_v31 = vpop.eup %915 }
 0x2fa   :  { %v581_v36 = vsel %vm205_vm3, %v1187_v31, 0.0 }
 0x2fd   :  { %v918_v34 = vpop.eup %917 }
 0x2fe   :  { %v584_v35 = vsel %vm205_vm3, %v918_v34, 0.0 }
 0x301   :  { %229 = vrot.lane.b32.xlu0 %v1139_v13, %s1044_s24  ;;  %s1061_s24 = smov 48  }
 0x31c   :  { %343 = vadd.xlane.f32.xlu1 %v342_v29 }
 0x320   :  { %464 = vadd.xlane.f32.xlu1 %v463_v32  ;;  %461 = vadd.xlane.f32.xlu0 %v460_v33 }
 0x324   :  { %585 = vadd.xlane.f32.xlu1 %v584_v35  ;;  %582 = vadd.xlane.f32.xlu0 %v581_v36 }
 0x335   :  { %471 = vrot.lane.b32.xlu1 %v1139_v13, %s1061_s24 }
 0x33a   :  { %592 = vrot.lane.b32.xlu0 %v1139_v13, %s1062_s27 }
 0x36c   :  { %v220_v37 = vpop.xlane.xlu0 %219 }
 0x36d   :  { %919 = vrcp.f32 %v220_v37 }
 0x370   :  { %v223_v38 = vpop.xlane.xlu1 %222 }
 0x371   :  { %921 = vrcp.f32 %v223_v38 }
 0x374   :  { %v341_v39 = vpop.xlane.xlu0 %340  ;;  %v351_v46 = vpop.permute.xlu1 %350 }
 0x375   :  { %923 = vrcp.f32 %v341_v39 }
 0x378   :  { %v230_v40 = vpop.permute.xlu0 %229 }
 0x379   :  { %812 = vmatpush3.bf16.msra.mxu0 %v230_v40 }
 0x37a   :  { %823 = vmatprep.subr.bf16.mxu0 %v1051_v0  ;;  %v920_v41 = vpop.eup %919 }
 0x37b   :  { %v226_v43 = vmul.f32 %v920_v41, %v904_v5 }
 0x37e   :  { %v922_v42 = vpop.eup %921 }
 0x37f   :  { %v227_v44 = vmul.f32 %v922_v42, %v906_v7  ;;  %v771_v42 = vld [vmem:[%s1233_s4] ss:$0 sm:$0xff] }
 0x381   :  { %v228_v45 = vpack.c.bf16 %v227_v44, %v226_v43 }
 0x382   :  { %v924_v51 = vpop.eup %923 }
 0x383   :  { %814 = vmatmul.mubr.msk.bf16.vlgmr.msra.gmra.mxu0 %vm205_vm3, %v228_v45  ;;  %v347_v53 = vmul.f32 %v924_v51, %v1179_v9 }
 0x384   :  { %824 = vmatpush3.bf16.msra.mxu0 %v351_v46  ;;  %825 = vmatprep.mubr.msk.bf16.mxu0 %vm1052_vm0, %v1051_v0 }
 0x385   :  { %835 = vmatprep.subr.bf16.mxu0 %v1051_v0 }
 0x3a5   :  { %v344_v13 = vpop.xlane.xlu1 %343 }
 0x3a6   :  { %925 = vrcp.f32 %v344_v13 }
 0x3a9   :  { %v465_v47 = vpop.xlane.xlu1 %464  ;;  %v462_v48 = vpop.xlane.xlu0 %461 }
 0x3aa   :  { %927 = vrcp.f32 %v465_v47 }
 0x3ab   :  { %929 = vrcp.f32 %v462_v48 }
 0x3ad   :  { %v586_v49 = vpop.xlane.xlu1 %585  ;;  %v583_v50 = vpop.xlane.xlu0 %582 }
 0x3ae   :  { %931 = vrcp.f32 %v586_v49 }
 0x3af   :  { %933 = vrcp.f32 %v583_v50 }
 0x3b1   :  { %v472_v58 = vpop.permute.xlu1 %471  ;;  %v593_v1 = vpop.permute.xlu0 %592 }
 0x3b3   :  { %v926_v52 = vpop.eup %925 }
 0x3b4   :  { %v348_v54 = vmul.f32 %v926_v52, %v910_v27 }
 0x3b6   :  { %v349_v55 = vpack.c.bf16 %v348_v54, %v347_v53 }
 0x3b7   :  { %v928_v56 = vpop.eup %927 }
 0x3b8   :  { %v930_v57 = vpop.eup %929  ;;  %826 = vmatmul.mubr.msk.bf16.vlgmr.msra.gmra.mxu0 %vm205_vm3, %v349_v55  ;;  %v469_v60 = vmul.f32 %v928_v56, %v914_v30 }
 0x3b9   :  { %836 = vmatpush3.bf16.msra.mxu0 %v472_v58  ;;  %837 = vmatprep.mubr.msk.bf16.mxu0 %vm1052_vm0, %v1051_v0  ;;  %v468_v59 = vmul.f32 %v930_v57, %v912_v28 }
 0x3ba   :  { %847 = vmatprep.subr.bf16.mxu0 %v1051_v0 }
 0x3bb   :  { %v932_v61 = vpop.eup %931  ;;  %v470_v62 = vpack.c.bf16 %v469_v60, %v468_v59 }
 0x3bc   :  { %v934_v63 = vpop.eup %933  ;;  %v590_v3 = vmul.f32 %v932_v61, %v918_v34 }
 0x3bd   :  { %v589_v2 = vmul.f32 %v934_v63, %v1187_v31 }
 0x3bf   :  { %v591_v4 = vpack.c.bf16 %v590_v3, %v589_v2 }
 0x3c0   :  { %838 = vmatmul.mubr.msk.bf16.vlgmr.msra.gmra.mxu0 %vm205_vm3, %v470_v62 }
 0x3c1   :  { %848 = vmatpush3.bf16.msra.mxu0 %v593_v1  ;;  %849 = vmatprep.mubr.msk.bf16.mxu0 %vm1052_vm0, %v1051_v0 }
 0x3c8   :  { %850 = vmatmul.mubr.msk.bf16.vlgmr.msra.gmra.mxu0 %vm205_vm3, %v591_v4 }
 0x443   :  { %v269_v5 = vpop.f32.mrf.mxu0 }
 0x445   :  { %v815_v6 = vpop.f32.mrf.mxu0 }
 0x447   :  { %v272_v7 = vpop.f32.mrf.mxu0 }
 0x449   :  { %v816_v8 = vpop.f32.mrf.mxu0 }
 0x478   :  { %v390_v9 = vpop.f32.mrf.mxu0 }
 0x47a   :  { %v827_v10 = vpop.f32.mrf.mxu0 }
 0x47c   :  { %v393_v11 = vpop.f32.mrf.mxu0 }
 0x47d   :  { %v884_v14 = vpack.i.bf16 %v393_v11, %v390_v9 }
 0x47e   :  { %v828_v15 = vpop.f32.mrf.mxu0 }
 0x47f   :  { %885 = vrot.lane.b32.xlu1 %v884_v14, %s1048_s8 }
 0x480   :  { %v511_v16 = vpop.f32.mrf.mxu0 }
 0x482   :  { %v839_v17 = vpop.f32.mrf.mxu0 }
 0x484   :  { %v514_v19 = vpop.f32.mrf.mxu0 }
 0x485   :  { %v889_v20 = vpack.i.bf16 %v514_v19, %v511_v16 }
 0x486   :  { %v840_v21 = vpop.f32.mrf.mxu0 }
 0x487   :  { %890 = vrot.lane.b32.xlu0 %v889_v20, %s1063_s28 }
 0x488   :  { %v632_v22 = vpop.f32.mrf.mxu0 }
 0x48a   :  { %v851_v23 = vpop.f32.mrf.mxu0 }
 0x48c   :  { %v635_v24 = vpop.f32.mrf.mxu0 }
 0x48d   :  { %v894_v25 = vpack.i.bf16 %v635_v24, %v632_v22 }
 0x48e   :  { %v852_v26 = vpop.f32.mrf.mxu0 }
 0x48f   :  { %895 = vrot.lane.b32.xlu1 %v894_v25, %s1064_s29 }
 0x4f1   :  { %v886_v27 = vpop.permute.xlu1 %885 }
 0x4f2   :  { %v888_v29 = vunpack.i.h.bf16 %v886_v27  ;;  %v887_v0 = vunpack.i.l.bf16 %v886_v27 }
 0x4f4   :  { %v664_v33 = vsel %vm157_vm2, %v272_v7, %v888_v29  ;;  %v663_v34 = vsel %vm157_vm2, %v269_v5, %v887_v0 }
 0x4f9   :  { %v891_v28 = vpop.permute.xlu0 %890 }
 0x4fa   :  { %v893_v30 = vunpack.i.h.bf16 %v891_v28  ;;  %v892_v31 = vunpack.i.l.bf16 %v891_v28 }
 0x4fc   :  { %v666_v37 = vsel %vm205_vm3, %v664_v33, %v893_v30  ;;  %v665_v38 = vsel %vm205_vm3, %v663_v34, %v892_v31 }
 0x501   :  { %v896_v32 = vpop.permute.xlu1 %895 }
 0x502   :  { %v898_v35 = vunpack.i.h.bf16 %v896_v32  ;;  %v897_v36 = vunpack.i.l.bf16 %v896_v32 }
 0x504   :  { %v669_v39 = vsel %vm667_vm4, %v666_v37, %v898_v35  ;;  %v668_v40 = vsel %vm667_vm4, %v665_v38, %v897_v36 }
 0x505   :  { %v670_v41 = vpack.c.bf16 %v669_v39, %v668_v40 }
 0x507   :  { %858 = vmatmul.mubr.msk.bf16.vlgmr.msra.gmra.mxu1 %vm106_vm1, %v670_v41 }
 0x5c7   :  { %v731_v43 = vpop.f32.mrf.mxu1 }
 0x5c8   :  { %v732_v44 = vadd.f32 %v771_v42, %v731_v43 }
 0x5c9   :  { %v859_v45 = vpop.f32.mrf.mxu1 }
 0x5ca   :  { %738 = vst.msk [vmem:[#allocation10] sm:$0xff] %vm106_vm1, %v732_v44 }
 0x5cb   :  { %v734_v46 = vpop.f32.mrf.mxu1 }
 0x5cc   :  { %v735_v13 = vadd.f32 %v771_v42, %v734_v46 }
 0x5cd   :  { %v860_v47 = vpop.f32.mrf.mxu1 }
 0x5ce   :  { %739 = vst.msk [vmem:[#allocation10 + $0x8] sm:$0xff] %vm106_vm1, %v735_v13 }
 0x5cf   :  { %1026 = shalt.err (!%p1023_p10)
}
 0x5d0   :  { %751 = dma.vmem_to_hbm [thread:$0]  %s746_s1, 256, %s1235_s6, [#allocation4], %s1047_s7, %s1047_s7, %s1048_s8  }
 0x5d1   :  { %1041 = dma.done.wait [#allocation4], 256  }
 0x5d2   :  { %1042 = vsyncadd [#allocation4], 4294967040 }
 0x5d3   :  { %755 = vsyncpa [#allocation3], 1 }
 0x5d4   :  { %756 = vsyncpa [#allocation6], 1 }
 0x5d5   :  { %757 = vsyncpa [#allocation9], 1 }
 0x5d6   :  { %758 = vsyncpa [#allocation4], 1 }

</bundles_post_ra>
